<compile_context>
chip_gen: v6e
topology: v6e:2x2x1
jax: 0.10.0
libtpu: 0.0.40
codegen_flags: <defaults>
</compile_context>

<pallas_src>
import functools

import jax
import jax.numpy as jnp
from jax import lax
from jax.experimental import pallas as pl
from jax.experimental.pallas import tpu as pltpu

DIM_EMBEDDING = 100
RNN_HIDDEN = 50

# Fuse the embedding lookup into the kernel while the padded projected table
# comfortably fits in VMEM; above that, gather rows with XLA instead.
_FUSE_TABLE_BYTES = 4 * 1024 * 1024


def _round_up(x, m):
    return ((x + m - 1) // m) * m


def _pad_to(x, shape):
    return jnp.pad(x, [(0, s - d) for d, s in zip(x.shape, shape)])


def _recurrence_and_head(xp_ref, whh_ref, wout_ref, bout_ref, out_ref,
                         hist_ref, *, T, B, K):
    """Serial tanh recurrence + hidden->tag projection + log_softmax.

    xp_ref   : (T*B, Hp)  precomputed  x_t @ W_ih^T + (b_ih + b_hh)
    hist_ref : (T*B, Hp)  scratch for the hidden-state history
    out_ref  : (T*B, Kp)  log-softmax tag scores
    """
    whh = whh_ref[...]                       # read the recurrent weight once
    Hp = whh.shape[0]

    def step(t, h_prev):
        row = pl.multiple_of(t * B, 8)       # B is padded to a multiple of 8
        x_t = xp_ref[pl.ds(row, B), :]                             # (B, Hp)
        h_new = jnp.tanh(
            x_t + jnp.dot(h_prev, whh, preferred_element_type=jnp.float32))
        hist_ref[pl.ds(row, B), :] = h_new
        return h_new

    h0 = jnp.zeros((B, Hp), jnp.float32)     # PyTorch default h_0 = 0
    lax.fori_loop(0, T, step, h0, unroll=True if T <= 16 else 8)

    # Batched output projection + log_softmax over the whole (T*B, Hp) slab.
    logits = (
        jnp.dot(hist_ref[...], wout_ref[...], preferred_element_type=jnp.float32)
        + bout_ref[...]
    )                                                              # (T*B, Kp)
    col = lax.broadcasted_iota(jnp.int32, logits.shape, 1)
    logits = jnp.where(col < K, logits, -1e30)                     # mask pad tags
    m = jnp.max(logits, axis=-1, keepdims=True)
    shifted = logits - m
    lse = jnp.log(jnp.sum(jnp.exp(shifted), axis=-1, keepdims=True))
    out_ref[...] = shifted - lse


def _fused_kernel(ids_ref, etab_ref, whh_ref, wout_ref, bout_ref, out_ref,
                  xp_ref, hist_ref, *, T, B, K):
    # Embedding lookup fused as a one-hot MXU matmul against the projected
    # table (input projection + biases already folded in).  Out-of-range pad
    # ids give an all-zero one-hot row -> xp row 0 -> padded batch rows stay 0.
    Vp = etab_ref.shape[0]
    TBp = xp_ref.shape[0]
    onehot = (
        ids_ref[...] == lax.broadcasted_iota(jnp.int32, (TBp, Vp), 1)
    ).astype(jnp.float32)
    xp_ref[...] = jnp.dot(onehot, etab_ref[...],
                          preferred_element_type=jnp.float32)
    _recurrence_and_head(xp_ref, whh_ref, wout_ref, bout_ref, out_ref,
                         hist_ref, T=T, B=B, K=K)


def _pregathered_kernel(xp_ref, whh_ref, wout_ref, bout_ref, out_ref,
                        hist_ref, *, T, B, K):
    _recurrence_and_head(xp_ref, whh_ref, wout_ref, bout_ref, out_ref,
                         hist_ref, T=T, B=B, K=K)


def simple_rnn_forward(sentences, params):
    """sentences: (B, T) int32 token ids.  Returns (B, T, tagset) log-probs."""
    emb = params["embedding"].astype(jnp.float32)                 # (V, D)
    w_ih = params["w_ih"].astype(jnp.float32)                     # (H, D)
    w_hh = params["w_hh"].astype(jnp.float32)                     # (H, H)
    b = (params["b_ih"] + params["b_hh"]).astype(jnp.float32)     # (H,)
    w_out = params["w_out"].astype(jnp.float32)                   # (K, H)
    b_out = params["b_out"].astype(jnp.float32)                   # (K,)

    B, T = sentences.shape
    V, _ = emb.shape
    H = w_hh.shape[0]
    K = w_out.shape[0]

    # Fold embedding + input projection + biases once, off the serial path.
    e_proj = emb @ w_ih.T + b                                     # (V, H)

    # Pad lane dims to 128 and the per-step batch to a full 8-sublane tile.
    H_pad = _round_up(H, 128)
    K_pad = _round_up(K, 128)
    V_pad = _round_up(V, 128)
    B_pad = _round_up(B, 8)
    TBp = T * B_pad

    whh_p  = _pad_to(w_hh.T, (H_pad, H_pad))                      # (Hp, Hp)
    wout_p = _pad_to(w_out.T, (H_pad, K_pad))                     # (Hp, Kp)
    bout_p = _pad_to(b_out.reshape(1, K), (1, K_pad))             # (1, Kp)

    # Time-major ids; batch padded with the out-of-range id V (zero one-hot).
    ids_tm = jnp.transpose(sentences).astype(jnp.int32)           # (T, B)
    ids_tm = jnp.pad(ids_tm, ((0, 0), (0, B_pad - B)), constant_values=V)

    fuse = V_pad * H_pad * 4 <= _FUSE_TABLE_BYTES

    if fuse:
        etab_p = _pad_to(e_proj, (V_pad, H_pad))                  # (Vp, Hp)
        kernel = functools.partial(_fused_kernel, T=T, B=B_pad, K=K)
        in_specs = [
            pl.BlockSpec((TBp, 1), lambda: (0, 0)),
            pl.BlockSpec((V_pad, H_pad), lambda: (0, 0)),
            pl.BlockSpec((H_pad, H_pad), lambda: (0, 0)),
            pl.BlockSpec((H_pad, K_pad), lambda: (0, 0)),
            pl.BlockSpec((1, K_pad), lambda: (0, 0)),
        ]
        scratch = [pltpu.VMEM((TBp, H_pad), jnp.float32),   # xp = onehot @ E_proj
                   pltpu.VMEM((TBp, H_pad), jnp.float32)]   # hidden history
        args = (ids_tm.reshape(TBp, 1), etab_p, whh_p, wout_p, bout_p)
    else:
        # Large vocab: XLA row gather of the projected table; the kernel keeps
        # the serial recurrence + head.
        ids_flat = jnp.minimum(ids_tm.reshape(-1), V - 1)         # clamp pad ids
        xp = jnp.take(_pad_to(e_proj, (V, H_pad)), ids_flat, axis=0)  # (TBp, Hp)
        kernel = functools.partial(_pregathered_kernel, T=T, B=B_pad, K=K)
        in_specs = [
            pl.BlockSpec((TBp, H_pad), lambda: (0, 0)),
            pl.BlockSpec((H_pad, H_pad), lambda: (0, 0)),
            pl.BlockSpec((H_pad, K_pad), lambda: (0, 0)),
            pl.BlockSpec((1, K_pad), lambda: (0, 0)),
        ]
        scratch = [pltpu.VMEM((TBp, H_pad), jnp.float32)]         # hidden history
        args = (xp, whh_p, wout_p, bout_p)

    out_flat = pl.pallas_call(
        kernel,
        out_shape=jax.ShapeDtypeStruct((TBp, K_pad), jnp.float32),
        grid=(),
        in_specs=in_specs,
        out_specs=pl.BlockSpec((TBp, K_pad), lambda: (0, 0)),
        scratch_shapes=scratch,
    )(*args)

    # (T*B_pad, Kp) -> (B, T, K)
    out = out_flat.reshape(T, B_pad, K_pad)[:, :B, :K]
    return jnp.transpose(out, (1, 0, 2))


def simple_rnn_reference(sentences, params):
    """Pure-JAX reference matching the PyTorch module semantics."""
    emb = jnp.take(params["embedding"], sentences, axis=0).astype(jnp.float32)
    W_ih, W_hh = params["w_ih"], params["w_hh"]
    b = params["b_ih"] + params["b_hh"]
    B, T = sentences.shape
    H = W_hh.shape[0]

    def step(h, x_t):
        h_new = jnp.tanh(x_t @ W_ih.T + h @ W_hh.T + b)
        return h_new, h_new

    h0 = jnp.zeros((B, H), jnp.float32)
    _, hs = lax.scan(step, h0, jnp.transpose(emb, (1, 0, 2)))      # (T, B, H)
    hs = jnp.transpose(hs, (1, 0, 2))                               # (B, T, H)
    logits = hs @ params["w_out"].T + params["b_out"]
    return jax.nn.log_softmax(logits, axis=-1)


def init_params(key, vocab_size, tagset_size):
    kE, k1, k2, k3, k4, k5, k6 = jax.random.split(key, 7)
    D, H, K = DIM_EMBEDDING, RNN_HIDDEN, tagset_size
    s_rnn = 1.0 / jnp.sqrt(H)
    s_lin = 1.0 / jnp.sqrt(H)
    return {
        "embedding": jax.random.normal(kE, (vocab_size, D), jnp.float32),
        "w_ih": jax.random.uniform(k1, (H, D), jnp.float32, -s_rnn, s_rnn),
        "w_hh": jax.random.uniform(k2, (H, H), jnp.float32, -s_rnn, s_rnn),
        "b_ih": jax.random.uniform(k3, (H,), jnp.float32, -s_rnn, s_rnn),
        "b_hh": jax.random.uniform(k4, (H,), jnp.float32, -s_rnn, s_rnn),
        "w_out": jax.random.uniform(k5, (K, H), jnp.float32, -s_lin, s_lin),
        "b_out": jax.random.uniform(k6, (K,), jnp.float32, -s_lin, s_lin),
    }


if __name__ == "__main__":
    VOCAB = 30
    TAGSET = 5
    B, T = 2, 8

    key = jax.random.PRNGKey(0)
    k_params, k_sent = jax.random.split(key)
    params = init_params(k_params, VOCAB, TAGSET)
    sentences = jax.random.randint(k_sent, (B, T), 0, VOCAB, dtype=jnp.int32)

    fwd = jax.jit(simple_rnn_forward)
    tag_scores = fwd(sentences, params)
    jax.block_until_ready(tag_scores)

    assert tag_scores.shape == (B, T, TAGSET)
    # log_softmax rows must sum to ~1 in prob space
    assert jnp.allclose(jnp.sum(jnp.exp(tag_scores), axis=-1), 1.0, atol=1e-4)
    # match the pure-JAX (PyTorch-semantics) reference
    ref = simple_rnn_reference(sentences, params)
    assert jnp.allclose(tag_scores, ref, atol=1e-4, rtol=1e-4)
    print("KERNEL_OK")
</pallas_src>

<mosaic_0001>
module attributes {stable_mosaic.version = 11 : i64} {
  func.func @_fused_kernel(%arg0: memref<64x1xi32, #tpu.memory_space<vmem>>, %arg1: memref<128x128xf32, #tpu.memory_space<vmem>>, %arg2: memref<128x128xf32, #tpu.memory_space<vmem>>, %arg3: memref<128x128xf32, #tpu.memory_space<vmem>>, %arg4: memref<1x128xf32, #tpu.memory_space<vmem>>, %arg5: memref<64x128xf32, #tpu.memory_space<vmem>>, %arg6: memref<64x128xf32, #tpu.memory_space<vmem>>, %arg7: memref<64x128xf32, #tpu.memory_space<vmem>>) attributes {dimension_semantics = [], scalar_prefetch = 0 : i64, scratch_operands = 2 : i64, tpu.core_type = #tpu.core_type<tc>} {
    %c0 = arith.constant 0 : index
    %c0_0 = arith.constant 0 : index
    %0 = vector.load %arg0[%c0, %c0_0] : memref<64x1xi32, #tpu.memory_space<vmem>>, vector<64x1xi32>
    %1 = tpu.iota {dimensions = array<i32: 1>} : vector<64x128xi32>
    %2 = vector.broadcast %0 : vector<64x1xi32> to vector<64x128xi32>
    %3 = arith.cmpi eq, %2, %1 : vector<64x128xi32>
    %4 = arith.extui %3 : vector<64x128xi1> to vector<64x128xi32>
    %5 = arith.sitofp %4 : vector<64x128xi32> to vector<64x128xf32>
    %c0_1 = arith.constant 0 : index
    %c0_2 = arith.constant 0 : index
    %6 = vector.load %arg1[%c0_1, %c0_2] : memref<128x128xf32, #tpu.memory_space<vmem>>, vector<128x128xf32>
    %cst = arith.constant dense<0.000000e+00> : vector<64x128xf32>
    %7 = tpu.matmul %5, %6, %cst {dimension_numbers = #tpu.dot_dimension_numbers<[1], [0], [0], [1], [0, 0, 1, 1], [], []>} : vector<64x128xf32>, vector<128x128xf32>, vector<64x128xf32> -> vector<64x128xf32>
    %c0_3 = arith.constant 0 : index
    %c0_4 = arith.constant 0 : index
    %8 = vector.load %arg6[%c0_3, %c0_4] : memref<64x128xf32, #tpu.memory_space<vmem>>, vector<64x128xf32>
    tpu.vector_store %arg6[%c0_3, %c0_4], %7 {strides = array<i32>} : memref<64x128xf32, #tpu.memory_space<vmem>>, vector<64x128xf32>,
    %c0_5 = arith.constant 0 : index
    %c0_6 = arith.constant 0 : index
    %9 = vector.load %arg2[%c0_5, %c0_6] : memref<128x128xf32, #tpu.memory_space<vmem>>, vector<128x128xf32>
    %cst_7 = arith.constant 0.000000e+00 : f32
    %10 = vector.broadcast %cst_7 : f32 to vector<8x128xf32>
    %c0_i32 = arith.constant 0 : i32
    %c8_i32 = arith.constant 8 : i32
    %11 = arith.muli %c0_i32, %c8_i32 : i32
    %12 = tpu.assume_multiple %11, 8 : i32
    %13 = arith.index_cast %12 : i32 to index
    %c0_8 = arith.constant 0 : index
    %14 = vector.load %arg6[%13, %c0_8] : memref<64x128xf32, #tpu.memory_space<vmem>>, vector<8x128xf32>
    %cst_9 = arith.constant dense<0.000000e+00> : vector<8x128xf32>
    %15 = tpu.matmul %10, %9, %cst_9 {dimension_numbers = #tpu.dot_dimension_numbers<[1], [0], [0], [1], [0, 0, 1, 1], [], []>} : vector<8x128xf32>, vector<128x128xf32>, vector<8x128xf32> -> vector<8x128xf32>
    %16 = arith.addf %14, %15 : vector<8x128xf32>
    %17 = math.tanh %16 : vector<8x128xf32>
    %18 = arith.index_cast %12 : i32 to index
    %c0_10 = arith.constant 0 : index
    %19 = vector.load %arg7[%18, %c0_10] : memref<64x128xf32, #tpu.memory_space<vmem>>, vector<8x128xf32>
    tpu.vector_store %arg7[%18, %c0_10], %17 {strides = array<i32>} : memref<64x128xf32, #tpu.memory_space<vmem>>, vector<8x128xf32>,
    %c1_i32 = arith.constant 1 : i32
    %c8_i32_11 = arith.constant 8 : i32
    %20 = arith.muli %c1_i32, %c8_i32_11 : i32
    %21 = tpu.assume_multiple %20, 8 : i32
    %22 = arith.index_cast %21 : i32 to index
    %c0_12 = arith.constant 0 : index
    %23 = vector.load %arg6[%22, %c0_12] : memref<64x128xf32, #tpu.memory_space<vmem>>, vector<8x128xf32>
    %cst_13 = arith.constant dense<0.000000e+00> : vector<8x128xf32>
    %24 = tpu.matmul %17, %9, %cst_13 {dimension_numbers = #tpu.dot_dimension_numbers<[1], [0], [0], [1], [0, 0, 1, 1], [], []>} : vector<8x128xf32>, vector<128x128xf32>, vector<8x128xf32> -> vector<8x128xf32>
    %25 = arith.addf %23, %24 : vector<8x128xf32>
    %26 = math.tanh %25 : vector<8x128xf32>
    %27 = arith.index_cast %21 : i32 to index
    %c0_14 = arith.constant 0 : index
    %28 = vector.load %arg7[%27, %c0_14] : memref<64x128xf32, #tpu.memory_space<vmem>>, vector<8x128xf32>
    tpu.vector_store %arg7[%27, %c0_14], %26 {strides = array<i32>} : memref<64x128xf32, #tpu.memory_space<vmem>>, vector<8x128xf32>,
    %c2_i32 = arith.constant 2 : i32
    %c8_i32_15 = arith.constant 8 : i32
    %29 = arith.muli %c2_i32, %c8_i32_15 : i32
    %30 = tpu.assume_multiple %29, 8 : i32
    %31 = arith.index_cast %30 : i32 to index
    %c0_16 = arith.constant 0 : index
    %32 = vector.load %arg6[%31, %c0_16] : memref<64x128xf32, #tpu.memory_space<vmem>>, vector<8x128xf32>
    %cst_17 = arith.constant dense<0.000000e+00> : vector<8x128xf32>
    %33 = tpu.matmul %26, %9, %cst_17 {dimension_numbers = #tpu.dot_dimension_numbers<[1], [0], [0], [1], [0, 0, 1, 1], [], []>} : vector<8x128xf32>, vector<128x128xf32>, vector<8x128xf32> -> vector<8x128xf32>
    %34 = arith.addf %32, %33 : vector<8x128xf32>
    %35 = math.tanh %34 : vector<8x128xf32>
    %36 = arith.index_cast %30 : i32 to index
    %c0_18 = arith.constant 0 : index
    %37 = vector.load %arg7[%36, %c0_18] : memref<64x128xf32, #tpu.memory_space<vmem>>, vector<8x128xf32>
    tpu.vector_store %arg7[%36, %c0_18], %35 {strides = array<i32>} : memref<64x128xf32, #tpu.memory_space<vmem>>, vector<8x128xf32>,
    %c3_i32 = arith.constant 3 : i32
    %c8_i32_19 = arith.constant 8 : i32
    %38 = arith.muli %c3_i32, %c8_i32_19 : i32
    %39 = tpu.assume_multiple %38, 8 : i32
    %40 = arith.index_cast %39 : i32 to index
    %c0_20 = arith.constant 0 : index
    %41 = vector.load %arg6[%40, %c0_20] : memref<64x128xf32, #tpu.memory_space<vmem>>, vector<8x128xf32>
    %cst_21 = arith.constant dense<0.000000e+00> : vector<8x128xf32>
    %42 = tpu.matmul %35, %9, %cst_21 {dimension_numbers = #tpu.dot_dimension_numbers<[1], [0], [0], [1], [0, 0, 1, 1], [], []>} : vector<8x128xf32>, vector<128x128xf32>, vector<8x128xf32> -> vector<8x128xf32>
    %43 = arith.addf %41, %42 : vector<8x128xf32>
    %44 = math.tanh %43 : vector<8x128xf32>
    %45 = arith.index_cast %39 : i32 to index
    %c0_22 = arith.constant 0 : index
    %46 = vector.load %arg7[%45, %c0_22] : memref<64x128xf32, #tpu.memory_space<vmem>>, vector<8x128xf32>
    tpu.vector_store %arg7[%45, %c0_22], %44 {strides = array<i32>} : memref<64x128xf32, #tpu.memory_space<vmem>>, vector<8x128xf32>,
    %c4_i32 = arith.constant 4 : i32
    %c8_i32_23 = arith.constant 8 : i32
    %47 = arith.muli %c4_i32, %c8_i32_23 : i32
    %48 = tpu.assume_multiple %47, 8 : i32
    %49 = arith.index_cast %48 : i32 to index
    %c0_24 = arith.constant 0 : index
    %50 = vector.load %arg6[%49, %c0_24] : memref<64x128xf32, #tpu.memory_space<vmem>>, vector<8x128xf32>
    %cst_25 = arith.constant dense<0.000000e+00> : vector<8x128xf32>
    %51 = tpu.matmul %44, %9, %cst_25 {dimension_numbers = #tpu.dot_dimension_numbers<[1], [0], [0], [1], [0, 0, 1, 1], [], []>} : vector<8x128xf32>, vector<128x128xf32>, vector<8x128xf32> -> vector<8x128xf32>
    %52 = arith.addf %50, %51 : vector<8x128xf32>
    %53 = math.tanh %52 : vector<8x128xf32>
    %54 = arith.index_cast %48 : i32 to index
    %c0_26 = arith.constant 0 : index
    %55 = vector.load %arg7[%54, %c0_26] : memref<64x128xf32, #tpu.memory_space<vmem>>, vector<8x128xf32>
    tpu.vector_store %arg7[%54, %c0_26], %53 {strides = array<i32>} : memref<64x128xf32, #tpu.memory_space<vmem>>, vector<8x128xf32>,
    %c5_i32 = arith.constant 5 : i32
    %c8_i32_27 = arith.constant 8 : i32
    %56 = arith.muli %c5_i32, %c8_i32_27 : i32
    %57 = tpu.assume_multiple %56, 8 : i32
    %58 = arith.index_cast %57 : i32 to index
    %c0_28 = arith.constant 0 : index
    %59 = vector.load %arg6[%58, %c0_28] : memref<64x128xf32, #tpu.memory_space<vmem>>, vector<8x128xf32>
    %cst_29 = arith.constant dense<0.000000e+00> : vector<8x128xf32>
    %60 = tpu.matmul %53, %9, %cst_29 {dimension_numbers = #tpu.dot_dimension_numbers<[1], [0], [0], [1], [0, 0, 1, 1], [], []>} : vector<8x128xf32>, vector<128x128xf32>, vector<8x128xf32> -> vector<8x128xf32>
    %61 = arith.addf %59, %60 : vector<8x128xf32>
    %62 = math.tanh %61 : vector<8x128xf32>
    %63 = arith.index_cast %57 : i32 to index
    %c0_30 = arith.constant 0 : index
    %64 = vector.load %arg7[%63, %c0_30] : memref<64x128xf32, #tpu.memory_space<vmem>>, vector<8x128xf32>
    tpu.vector_store %arg7[%63, %c0_30], %62 {strides = array<i32>} : memref<64x128xf32, #tpu.memory_space<vmem>>, vector<8x128xf32>,
    %c6_i32 = arith.constant 6 : i32
    %c8_i32_31 = arith.constant 8 : i32
    %65 = arith.muli %c6_i32, %c8_i32_31 : i32
    %66 = tpu.assume_multiple %65, 8 : i32
    %67 = arith.index_cast %66 : i32 to index
    %c0_32 = arith.constant 0 : index
    %68 = vector.load %arg6[%67, %c0_32] : memref<64x128xf32, #tpu.memory_space<vmem>>, vector<8x128xf32>
    %cst_33 = arith.constant dense<0.000000e+00> : vector<8x128xf32>
    %69 = tpu.matmul %62, %9, %cst_33 {dimension_numbers = #tpu.dot_dimension_numbers<[1], [0], [0], [1], [0, 0, 1, 1], [], []>} : vector<8x128xf32>, vector<128x128xf32>, vector<8x128xf32> -> vector<8x128xf32>
    %70 = arith.addf %68, %69 : vector<8x128xf32>
    %71 = math.tanh %70 : vector<8x128xf32>
    %72 = arith.index_cast %66 : i32 to index
    %c0_34 = arith.constant 0 : index
    %73 = vector.load %arg7[%72, %c0_34] : memref<64x128xf32, #tpu.memory_space<vmem>>, vector<8x128xf32>
    tpu.vector_store %arg7[%72, %c0_34], %71 {strides = array<i32>} : memref<64x128xf32, #tpu.memory_space<vmem>>, vector<8x128xf32>,
    %c7_i32 = arith.constant 7 : i32
    %c8_i32_35 = arith.constant 8 : i32
    %74 = arith.muli %c7_i32, %c8_i32_35 : i32
    %75 = tpu.assume_multiple %74, 8 : i32
    %76 = arith.index_cast %75 : i32 to index
    %c0_36 = arith.constant 0 : index
    %77 = vector.load %arg6[%76, %c0_36] : memref<64x128xf32, #tpu.memory_space<vmem>>, vector<8x128xf32>
    %cst_37 = arith.constant dense<0.000000e+00> : vector<8x128xf32>
    %78 = tpu.matmul %71, %9, %cst_37 {dimension_numbers = #tpu.dot_dimension_numbers<[1], [0], [0], [1], [0, 0, 1, 1], [], []>} : vector<8x128xf32>, vector<128x128xf32>, vector<8x128xf32> -> vector<8x128xf32>
    %79 = arith.addf %77, %78 : vector<8x128xf32>
    %80 = math.tanh %79 : vector<8x128xf32>
    %81 = arith.index_cast %75 : i32 to index
    %c0_38 = arith.constant 0 : index
    %82 = vector.load %arg7[%81, %c0_38] : memref<64x128xf32, #tpu.memory_space<vmem>>, vector<8x128xf32>
    tpu.vector_store %arg7[%81, %c0_38], %80 {strides = array<i32>} : memref<64x128xf32, #tpu.memory_space<vmem>>, vector<8x128xf32>,
    %c8_i32_39 = arith.constant 8 : i32
    %c0_40 = arith.constant 0 : index
    %c0_41 = arith.constant 0 : index
    %83 = vector.load %arg7[%c0_40, %c0_41] : memref<64x128xf32, #tpu.memory_space<vmem>>, vector<64x128xf32>
    %c0_42 = arith.constant 0 : index
    %c0_43 = arith.constant 0 : index
    %84 = vector.load %arg3[%c0_42, %c0_43] : memref<128x128xf32, #tpu.memory_space<vmem>>, vector<128x128xf32>
    %cst_44 = arith.constant dense<0.000000e+00> : vector<64x128xf32>
    %85 = tpu.matmul %83, %84, %cst_44 {dimension_numbers = #tpu.dot_dimension_numbers<[1], [0], [0], [1], [0, 0, 1, 1], [], []>} : vector<64x128xf32>, vector<128x128xf32>, vector<64x128xf32> -> vector<64x128xf32>
    %c0_45 = arith.constant 0 : index
    %c0_46 = arith.constant 0 : index
    %86 = vector.load %arg4[%c0_45, %c0_46] : memref<1x128xf32, #tpu.memory_space<vmem>>, vector<1x128xf32>
    %87 = vector.broadcast %86 : vector<1x128xf32> to vector<64x128xf32>
    %88 = arith.addf %85, %87 : vector<64x128xf32>
    %89 = tpu.iota {dimensions = array<i32: 1>} : vector<64x128xi32>
    %c5_i32_47 = arith.constant 5 : i32
    %90 = vector.broadcast %c5_i32_47 : i32 to vector<64x128xi32>
    %91 = arith.cmpi slt, %89, %90 : vector<64x128xi32>
    %cst_48 = arith.constant -1.000000e+30 : f32
    %92 = vector.broadcast %cst_48 : f32 to vector<64x128xf32>
    %93 = arith.select %91, %88, %92 : vector<64x128xi1>, vector<64x128xf32>
    %cst_49 = arith.constant dense<0xFF800000> : vector<64xf32>
    %94 = vector.multi_reduction <maximumf>, %93, %cst_49 [1] : vector<64x128xf32> to vector<64xf32>
    %95 = vector.shape_cast %94 : vector<64xf32> to vector<64x1xf32>
    %96 = vector.broadcast %95 : vector<64x1xf32> to vector<64x128xf32>
    %97 = arith.subf %93, %96 : vector<64x128xf32>
    %98 = math.exp %97 : vector<64x128xf32>
    %cst_50 = arith.constant dense<0.000000e+00> : vector<64xf32>
    %99 = vector.multi_reduction <add>, %98, %cst_50 [1] : vector<64x128xf32> to vector<64xf32>
    %100 = vector.shape_cast %99 : vector<64xf32> to vector<64x1xf32>
    %101 = math.log %100 : vector<64x1xf32>
    %102 = vector.broadcast %101 : vector<64x1xf32> to vector<64x128xf32>
    %103 = arith.subf %97, %102 : vector<64x128xf32>
    %c0_51 = arith.constant 0 : index
    %c0_52 = arith.constant 0 : index
    %104 = vector.load %arg5[%c0_51, %c0_52] : memref<64x128xf32, #tpu.memory_space<vmem>>, vector<64x128xf32>
    tpu.vector_store %arg5[%c0_51, %c0_52], %103 {strides = array<i32>} : memref<64x128xf32, #tpu.memory_space<vmem>>, vector<64x128xf32>,
    return
  }
}

</mosaic_0001>

<bundles_post_ra>
// kernel: simple_rnn_forward.1
= control target key start
LH: loop header
LB: loop body
LE: loop exit
PB: predicated region body
PF: predicated region fallthrough
CT: control target
= control target key end

     0   :  { %v1689_v0 = vmov 0   ;;  %v1690_v6 = vmov 0.0   ;;  %vm1691_vm0 = vmmov 0   ;;  %v28_v42 = vlaneseq  ;;  %s2309_s0 = inlined_call_operand.vmem [shape: s32[64,1], index: 0, kind: input, shape index: {}]   ;;  %s2310_s1 = inlined_call_operand.vmem [shape: f32[128,128], index: 1, kind: input, shape index: {}]   ;;  %s2311_s2 = inlined_call_operand.vmem [shape: f32[128,128], index: 2, kind: input, shape index: {}]   ;;  %s2312_s3 = inlined_call_operand.vmem [shape: f32[128,128], index: 3, kind: input, shape index: {}]   ;;  %s2313_s4 = inlined_call_operand.vmem [shape: f32[1,128], index: 4, kind: input, shape index: {}]   ;;  %s2314_s5 = inlined_call_operand.vmem [shape: f32[64,128], index: 5, kind: output, shape index: {}]  }
   0x1   :  { %1639 = vset.pattern.permute.xlu0 %v1689_v0  ;;  %v20_v1 = vld [vmem:[%s2309_s0] sm:$0xff]  ;;  %1640 = vset.pattern.permute.xlu1 %v1689_v0  ;;  %v22_v2 = vld [vmem:[%s2309_s0 + $0x10] sm:$0xff]  ;;  %v21_v3 = vld [vmem:[%s2309_s0 + $0x8] sm:$0xff]  ;;  %v1692_v46 = vmov 1.0  }
   0x2   :  { %31 = vperm.xlu0 %1639, %v20_v1   ;;  %37 = vperm.xlu1 %1640, %v22_v2   ;;  %v23_v4 = vld [vmem:[%s2309_s0 + $0x18] sm:$0xff]  ;;  %v92_v8 = vld [vmem:[%s2310_s1 + $0x70] sm:$0xff]  ;;  %v91_v10 = vld [vmem:[%s2310_s1 + $0x68] sm:$0xff]  ;;  %v1946_v43 = vand.u32 127, %v28_v42 }
   0x3   :  { %v93_v5 = vld [vmem:[%s2310_s1 + $0x78] sm:$0xff]  ;;  %1311 = vmatprep.subr.mxu1 %v1690_v6  ;;  %1343 = vmatprep.mubr.msk.f32.mxu1 %vm1691_vm0, %v1690_v6  ;;  %v1753_v9 = vld [vmem:[%s2311_s2 + $0x70] sm:$0xff]  ;;  %v1762_v11 = vld [vmem:[%s2311_s2 + $0x68] sm:$0xff] }
   0x4   :  { %v1742_v7 = vld [vmem:[%s2311_s2 + $0x78] sm:$0xff]  ;;  %1267 = vmatprep.subr.mxu0 %v93_v5  ;;  %v24_v12 = vld [vmem:[%s2309_s0 + $0x20] sm:$0xff]  ;;  %v25_v13 = vld [vmem:[%s2309_s0 + $0x28] sm:$0xff]  ;;  %vm965_vm9 = vcmp.lt.s32.totalorder %v1946_v43, 5 }
   0x5   :  { %1312 = vmatpush3.msra.mxu1 %v1742_v7  ;;  %1268 = vmatpush3.msra.mxu0 %v93_v5  ;;  %v90_v14 = vld [vmem:[%s2310_s1 + $0x60] sm:$0xff]  ;;  %v26_v16 = vld [vmem:[%s2309_s0 + $0x30] sm:$0xff]  ;;  %v89_v17 = vld [vmem:[%s2310_s1 + $0x58] sm:$0xff] }
   0x6   :  { %1313 = vmatprep.subr.mxu1 %v1690_v6  ;;  %34 = vperm.xlu0 %1639, %v21_v3   ;;  %v1779_v15 = vld [vmem:[%s2311_s2 + $0x60] sm:$0xff]  ;;  %v1792_v18 = vld [vmem:[%s2311_s2 + $0x58] sm:$0xff]  ;;  %v88_v19 = vld [vmem:[%s2310_s1 + $0x50] sm:$0xff] }
   0x7   :  { %40 = vperm.xlu1 %1640, %v23_v4   ;;  %1269 = vmatprep.subr.mxu0 %v92_v8  ;;  %v1801_v20 = vld [vmem:[%s2311_s2 + $0x50] sm:$0xff]  ;;  %v87_v21 = vld [vmem:[%s2310_s1 + $0x48] sm:$0xff]  ;;  %v86_v23 = vld [vmem:[%s2310_s1 + $0x40] sm:$0xff] }
   0x8   :  { %1314 = vmatpush3.msra.mxu1 %v1753_v9  ;;  %1270 = vmatpush3.msra.mxu0 %v92_v8  ;;  %v1811_v22 = vld [vmem:[%s2311_s2 + $0x48] sm:$0xff]  ;;  %v1821_v24 = vld [vmem:[%s2311_s2 + $0x40] sm:$0xff]  ;;  %v85_v25 = vld [vmem:[%s2310_s1 + $0x38] sm:$0xff] }
   0x9   :  { %1315 = vmatprep.subr.mxu1 %v1690_v6  ;;  %1271 = vmatprep.subr.mxu0 %v91_v10  ;;  %v1831_v26 = vld [vmem:[%s2311_s2 + $0x38] sm:$0xff]  ;;  %v84_v27 = vld [vmem:[%s2310_s1 + $0x30] sm:$0xff]  ;;  %v83_v29 = vld [vmem:[%s2310_s1 + $0x28] sm:$0xff] }
   0xa   :  { %1316 = vmatpush3.msra.mxu1 %v1762_v11  ;;  %43 = vperm.xlu0 %1639, %v24_v12   ;;  %v1841_v28 = vld [vmem:[%s2311_s2 + $0x30] sm:$0xff]  ;;  %v1851_v30 = vld [vmem:[%s2311_s2 + $0x28] sm:$0xff]  ;;  %v82_v31 = vld [vmem:[%s2310_s1 + $0x20] sm:$0xff] }
   0xb   :  { %46 = vperm.xlu1 %1640, %v25_v13   ;;  %1272 = vmatpush3.msra.mxu0 %v91_v10  ;;  %v1861_v32 = vld [vmem:[%s2311_s2 + $0x20] sm:$0xff]  ;;  %v81_v33 = vld [vmem:[%s2310_s1 + $0x18] sm:$0xff]  ;;  %v80_v35 = vld [vmem:[%s2310_s1 + $0x10] sm:$0xff] }
   0xc   :  { %1317 = vmatprep.subr.mxu1 %v1690_v6  ;;  %1273 = vmatprep.subr.mxu0 %v90_v14  ;;  %v1871_v34 = vld [vmem:[%s2311_s2 + $0x18] sm:$0xff]  ;;  %v1881_v36 = vld [vmem:[%s2311_s2 + $0x10] sm:$0xff]  ;;  %v79_v37 = vld [vmem:[%s2310_s1 + $0x8] sm:$0xff] }
   0xd   :  { %1318 = vmatpush3.msra.mxu1 %v1779_v15  ;;  %1274 = vmatpush3.msra.mxu0 %v90_v14  ;;  %v1891_v38 = vld [vmem:[%s2311_s2 + $0x8] sm:$0xff]  ;;  %v78_v39 = vld [vmem:[%s2310_s1] sm:$0xff]  ;;  %v27_v41 = vld [vmem:[%s2309_s0 + $0x38] sm:$0xff] }
   0xe   :  { %1319 = vmatprep.subr.mxu1 %v1690_v6  ;;  %49 = vperm.xlu0 %1639, %v26_v16   ;;  %v1901_v40 = vld [vmem:[%s2311_s2] sm:$0xff] }
   0xf   :  { %1275 = vmatprep.subr.mxu0 %v89_v17  ;;  %1320 = vmatpush3.msra.mxu1 %v1792_v18 }
  0x10   :  { %1276 = vmatpush3.msra.mxu0 %v89_v17  ;;  %1321 = vmatprep.subr.mxu1 %v1690_v6 }
  0x11   :  { %1277 = vmatprep.subr.mxu0 %v88_v19  ;;  %1322 = vmatpush3.msra.mxu1 %v1801_v20 }
  0x12   :  { %1278 = vmatpush3.msra.mxu0 %v88_v19  ;;  %1323 = vmatprep.subr.mxu1 %v1690_v6 }
  0x13   :  { %1279 = vmatprep.subr.mxu0 %v87_v21  ;;  %1324 = vmatpush3.msra.mxu1 %v1811_v22 }
  0x14   :  { %1280 = vmatpush3.msra.mxu0 %v87_v21  ;;  %1325 = vmatprep.subr.mxu1 %v1690_v6 }
  0x15   :  { %1281 = vmatprep.subr.mxu0 %v86_v23  ;;  %1326 = vmatpush3.msra.mxu1 %v1821_v24 }
  0x16   :  { %1282 = vmatpush3.msra.mxu0 %v86_v23  ;;  %1327 = vmatprep.subr.mxu1 %v1690_v6 }
  0x17   :  { %1283 = vmatprep.subr.mxu0 %v85_v25  ;;  %1328 = vmatpush3.msra.mxu1 %v1831_v26 }
  0x18   :  { %1284 = vmatpush3.msra.mxu0 %v85_v25  ;;  %1329 = vmatprep.subr.mxu1 %v1690_v6 }
  0x19   :  { %1285 = vmatprep.subr.mxu0 %v84_v27  ;;  %1330 = vmatpush3.msra.mxu1 %v1841_v28 }
  0x1a   :  { %1286 = vmatpush3.msra.mxu0 %v84_v27  ;;  %1331 = vmatprep.subr.mxu1 %v1690_v6  ;;  %v846_v27 = vld [vmem:[%s2312_s3 + $0x48] sm:$0xff] }
  0x1b   :  { %1287 = vmatprep.subr.mxu0 %v83_v29  ;;  %1332 = vmatpush3.msra.mxu1 %v1851_v30 }
  0x1c   :  { %1288 = vmatpush3.msra.mxu0 %v83_v29  ;;  %1333 = vmatprep.subr.mxu1 %v1690_v6  ;;  %v844_v29 = vld [vmem:[%s2312_s3 + $0x38] sm:$0xff] }
  0x1d   :  { %1289 = vmatprep.subr.mxu0 %v82_v31  ;;  %1334 = vmatpush3.msra.mxu1 %v1861_v32 }
  0x1e   :  { %1290 = vmatpush3.msra.mxu0 %v82_v31  ;;  %1335 = vmatprep.subr.mxu1 %v1690_v6  ;;  %v842_v31 = vld [vmem:[%s2312_s3 + $0x28] sm:$0xff] }
  0x1f   :  { %1291 = vmatprep.subr.mxu0 %v81_v33  ;;  %1336 = vmatpush3.msra.mxu1 %v1871_v34 }
  0x20   :  { %1292 = vmatpush3.msra.mxu0 %v81_v33  ;;  %1337 = vmatprep.subr.mxu1 %v1690_v6  ;;  %v840_v33 = vld [vmem:[%s2312_s3 + $0x18] sm:$0xff] }
  0x21   :  { %1293 = vmatprep.subr.mxu0 %v80_v35  ;;  %1338 = vmatpush3.msra.mxu1 %v1881_v36 }
  0x22   :  { %1294 = vmatpush3.msra.mxu0 %v80_v35  ;;  %1339 = vmatprep.subr.mxu1 %v1690_v6  ;;  %v838_v35 = vld [vmem:[%s2312_s3 + $0x8] sm:$0xff] }
  0x23   :  { %1295 = vmatprep.subr.mxu0 %v79_v37  ;;  %1340 = vmatpush3.msra.mxu1 %v1891_v38 }
  0x24   :  { %1296 = vmatpush3.msra.mxu0 %v79_v37  ;;  %1341 = vmatprep.subr.mxu1 %v1690_v6 }
  0x25   :  { %1297 = vmatprep.subr.mxu0 %v78_v39  ;;  %1342 = vmatpush3.msra.mxu1 %v1901_v40 }
  0x26   :  { %1298 = vmatpush3.msra.mxu0 %v78_v39  ;;  %1344 = vmatmul.mubr.f32.vlgmr.msra.gmra.mxu1 %v1690_v6 }
  0x27   :  { %52 = vperm.xlu1 %1640, %v27_v41   ;;  %1346 = vmatprep.subr.mxu0 %v1690_v6  ;;  %v1082_v41 = vld [vmem:[%s2313_s4] ss:$0 sm:$0xff] }
  0x28   :  { %1381 = vmatprep.subr.mxu1 %v1690_v6  ;;  %1413 = vmatprep.mubr.msk.f32.mxu1 %vm1691_vm0, %v1690_v6 }
  0x29   :  { %1382 = vmatpush3.msra.mxu1 %v1742_v7 }
  0x2a   :  { %1383 = vmatprep.subr.mxu1 %v1690_v6 }
  0x2b   :  { %1384 = vmatpush3.msra.mxu1 %v1753_v9 }
  0x2c   :  { %1385 = vmatprep.subr.mxu1 %v1690_v6 }
  0x2d   :  { %1386 = vmatpush3.msra.mxu1 %v1762_v11 }
  0x2e   :  { %1387 = vmatprep.subr.mxu1 %v1690_v6 }
  0x2f   :  { %1388 = vmatpush3.msra.mxu1 %v1779_v15 }
  0x30   :  { %1389 = vmatprep.subr.mxu1 %v1690_v6 }
  0x31   :  { %1390 = vmatpush3.msra.mxu1 %v1792_v18 }
  0x32   :  { %1391 = vmatprep.subr.mxu1 %v1690_v6 }
  0x33   :  { %1392 = vmatpush3.msra.mxu1 %v1801_v20 }
  0x34   :  { %1393 = vmatprep.subr.mxu1 %v1690_v6 }
  0x35   :  { %1394 = vmatpush3.msra.mxu1 %v1811_v22 }
  0x36   :  { %1395 = vmatprep.subr.mxu1 %v1690_v6 }
  0x37   :  { %1396 = vmatpush3.msra.mxu1 %v1821_v24 }
  0x38   :  { %1397 = vmatprep.subr.mxu1 %v1690_v6 }
  0x39   :  { %1398 = vmatpush3.msra.mxu1 %v1831_v26 }
  0x3a   :  { %1399 = vmatprep.subr.mxu1 %v1690_v6 }
  0x3b   :  { %1400 = vmatpush3.msra.mxu1 %v1841_v28 }
  0x3c   :  { %1401 = vmatprep.subr.mxu1 %v1690_v6 }
  0x3d   :  { %1402 = vmatpush3.msra.mxu1 %v1851_v30 }
  0x3e   :  { %1403 = vmatprep.subr.mxu1 %v1690_v6 }
  0x3f   :  { %1404 = vmatpush3.msra.mxu1 %v1861_v32 }
  0x40   :  { %1405 = vmatprep.subr.mxu1 %v1690_v6 }
  0x41   :  { %1406 = vmatpush3.msra.mxu1 %v1871_v34 }
  0x42   :  { %1407 = vmatprep.subr.mxu1 %v1690_v6 }
  0x43   :  { %1408 = vmatpush3.msra.mxu1 %v1881_v36 }
  0x44   :  { %1409 = vmatprep.subr.mxu1 %v1690_v6 }
  0x45   :  { %1410 = vmatpush3.msra.mxu1 %v1891_v38 }
  0x46   :  { %1411 = vmatprep.subr.mxu1 %v1690_v6 }
  0x47   :  { %1412 = vmatpush3.msra.mxu1 %v1901_v40 }
  0x48   :  { %1451 = vmatprep.subr.mxu1 %v1690_v6 }
  0x7d   :  { %v32_v44 = vpop.permute.xlu0 %31  ;;  %v38_v45 = vpop.permute.xlu1 %37 }
  0x7e   :  { %vm54_vm1 = vcmp.eq.s32.totalorder %v32_v44, %v1946_v43  ;;  %vm56_vm2 = vcmp.eq.s32.totalorder %v38_v45, %v1946_v43 }
  0x7f   :  { %1299 = vmatprep.mubr.msk.f32.mxu0 %vm54_vm1, %v1692_v46 }
  0x81   :  { %v35_v47 = vpop.permute.xlu0 %34 }
  0x82   :  { %v41_v48 = vpop.permute.xlu1 %40  ;;  %vm55_vm3 = vcmp.eq.s32.totalorder %v35_v47, %v1946_v43 }
  0x83   :  { %1300 = vmatmul.mubr.msk.f32.vlgmr.msra.gmra.mxu0 %vm55_vm3, %v1692_v46  ;;  %vm57_vm4 = vcmp.eq.s32.totalorder %v41_v48, %v1946_v43 }
  0x84   :  { %1302 = vmatprep.mubr.msk.f32.mxu0 %vm56_vm2, %v1692_v46  ;;  %1347 = vmatpush3.msra.mxu0 %v1742_v7 }
  0x85   :  { %v44_v49 = vpop.permute.xlu0 %43  ;;  %1348 = vmatprep.subr.mxu0 %v1690_v6 }
  0x86   :  { %v47_v50 = vpop.permute.xlu1 %46  ;;  %vm58_vm5 = vcmp.eq.s32.totalorder %v44_v49, %v1946_v43  ;;  %1349 = vmatpush3.msra.mxu0 %v1753_v9 }
  0x87   :  { %1303 = vmatmul.mubr.msk.f32.gmra.mxu0 %vm57_vm4, %v1692_v46  ;;  %1350 = vmatprep.subr.mxu0 %v1690_v6  ;;  %vm59_vm6 = vcmp.eq.s32.totalorder %v47_v50, %v1946_v43 }
  0x88   :  { %1305 = vmatprep.mubr.msk.f32.mxu0 %vm58_vm5, %v1692_v46  ;;  %1351 = vmatpush3.msra.mxu0 %v1762_v11 }
  0x89   :  { %v50_v51 = vpop.permute.xlu0 %49  ;;  %1352 = vmatprep.subr.mxu0 %v1690_v6 }
  0x8a   :  { %vm60_vm7 = vcmp.eq.s32.totalorder %v50_v51, %v1946_v43  ;;  %1353 = vmatpush3.msra.mxu0 %v1779_v15 }
  0x8b   :  { %1306 = vmatmul.mubr.msk.f32.gmra.mxu0 %vm59_vm6, %v1692_v46  ;;  %1354 = vmatprep.subr.mxu0 %v1690_v6 }
  0x8c   :  { %1308 = vmatprep.mubr.msk.f32.mxu0 %vm60_vm7, %v1692_v46  ;;  %1355 = vmatpush3.msra.mxu0 %v1792_v18 }
  0x8d   :  { %1356 = vmatprep.subr.mxu0 %v1690_v6 }
  0x8e   :  { %1357 = vmatpush3.msra.mxu0 %v1801_v20 }
  0x8f   :  { %1358 = vmatprep.subr.mxu0 %v1690_v6 }
  0x90   :  { %1359 = vmatpush3.msra.mxu0 %v1811_v22 }
  0x91   :  { %1360 = vmatprep.subr.mxu0 %v1690_v6 }
  0x92   :  { %1361 = vmatpush3.msra.mxu0 %v1821_v24 }
  0x93   :  { %1362 = vmatprep.subr.mxu0 %v1690_v6 }
  0x94   :  { %1363 = vmatpush3.msra.mxu0 %v1831_v26 }
  0x95   :  { %1364 = vmatprep.subr.mxu0 %v1690_v6 }
  0x96   :  { %1365 = vmatpush3.msra.mxu0 %v1841_v28 }
  0x97   :  { %1366 = vmatprep.subr.mxu0 %v1690_v6 }
  0x98   :  { %1367 = vmatpush3.msra.mxu0 %v1851_v30 }
  0x99   :  { %1368 = vmatprep.subr.mxu0 %v1690_v6 }
  0x9a   :  { %1369 = vmatpush3.msra.mxu0 %v1861_v32 }
  0x9b   :  { %1370 = vmatprep.subr.mxu0 %v1690_v6 }
  0x9c   :  { %1371 = vmatpush3.msra.mxu0 %v1871_v34 }
  0x9d   :  { %1372 = vmatprep.subr.mxu0 %v1690_v6 }
  0x9e   :  { %1373 = vmatpush3.msra.mxu0 %v1881_v36 }
  0x9f   :  { %1374 = vmatprep.subr.mxu0 %v1690_v6 }
  0xa0   :  { %1375 = vmatpush3.msra.mxu0 %v1891_v38 }
  0xa1   :  { %1376 = vmatprep.subr.mxu0 %v1690_v6 }
  0xa2   :  { %v53_v52 = vpop.permute.xlu1 %52  ;;  %1377 = vmatpush3.msra.mxu0 %v1901_v40 }
  0xa3   :  { %vm61_vm8 = vcmp.eq.s32.totalorder %v53_v52, %v1946_v43  ;;  %1416 = vmatprep.subr.mxu0 %v1690_v6 }
  0xa4   :  { %1309 = vmatmul.mubr.msk.f32.gmra.mxu0 %vm61_vm8, %v1692_v46 }
  0xa5   :  { %1378 = vmatprep.mubr.msk.f32.mxu0 %vm1691_vm0, %v1690_v6 }
  0xe6   :  { %v290_v53 = vpop.f32.mrf.mxu1 }
  0xe8   :  { %v1345_v54 = vpop.f32.mrf.mxu1 }
 0x143   :  { %v1301_v55 = vpop.f32.mrf.mxu0 }
 0x145   :  { %v160_v56 = vpop.f32.mrf.mxu0 }
 0x146   :  { %v294_v57 = vadd.f32 %v290_v53, %v160_v56 }
 0x147   :  { %v2027_v59 = vpop.f32.mrf.mxu0 }
 0x148   :  { %1641 = vtanh.f32 %v294_v57 }
 0x149   :  { %v170_v60 = vpop.f32.mrf.mxu0 }
 0x14b   :  { %v2029_v61 = vpop.f32.mrf.mxu0 }
 0x14d   :  { %v2031_v62 = vpop.f32.mrf.mxu0 }
 0x155   :  { %v1990_v58 = vpop.eup %1641 }
 0x156   :  { %1379 = vmatmul.mubr.f32.vlgmr.msra.gmra.mxu0 %v1990_v58 }
 0x157   :  { %1417 = vmatpush3.msra.mxu0 %v1742_v7  ;;  %1448 = vmatprep.mubr.msk.f32.mxu0 %vm1691_vm0, %v1690_v6 }
 0x158   :  { %1418 = vmatprep.subr.mxu0 %v1690_v6 }
 0x159   :  { %1419 = vmatpush3.msra.mxu0 %v1753_v9 }
 0x15a   :  { %1420 = vmatprep.subr.mxu0 %v1690_v6 }
 0x15b   :  { %1421 = vmatpush3.msra.mxu0 %v1762_v11 }
 0x15c   :  { %1422 = vmatprep.subr.mxu0 %v1690_v6 }
 0x15d   :  { %1423 = vmatpush3.msra.mxu0 %v1779_v15 }
 0x15e   :  { %1424 = vmatprep.subr.mxu0 %v1690_v6 }
 0x15f   :  { %1425 = vmatpush3.msra.mxu0 %v1792_v18 }
 0x160   :  { %1426 = vmatprep.subr.mxu0 %v1690_v6 }
 0x161   :  { %1427 = vmatpush3.msra.mxu0 %v1801_v20 }
 0x162   :  { %1428 = vmatprep.subr.mxu0 %v1690_v6 }
 0x163   :  { %1429 = vmatpush3.msra.mxu0 %v1811_v22 }
 0x164   :  { %1430 = vmatprep.subr.mxu0 %v1690_v6  ;;  %v2033_v63 = vpop.f32.mrf.mxu0 }
 0x165   :  { %1431 = vmatpush3.msra.mxu0 %v1821_v24 }
 0x166   :  { %1432 = vmatprep.subr.mxu0 %v1690_v6  ;;  %v2035_v0 = vpop.f32.mrf.mxu0 }
 0x167   :  { %1433 = vmatpush3.msra.mxu0 %v1831_v26 }
 0x168   :  { %1434 = vmatprep.subr.mxu0 %v1690_v6 }
 0x169   :  { %1435 = vmatpush3.msra.mxu0 %v1841_v28 }
 0x16a   :  { %1436 = vmatprep.subr.mxu0 %v1690_v6 }
 0x16b   :  { %1437 = vmatpush3.msra.mxu0 %v1851_v30 }
 0x16c   :  { %1438 = vmatprep.subr.mxu0 %v1690_v6 }
 0x16d   :  { %1439 = vmatpush3.msra.mxu0 %v1861_v32 }
 0x16e   :  { %1440 = vmatprep.subr.mxu0 %v1690_v6 }
 0x16f   :  { %1441 = vmatpush3.msra.mxu0 %v1871_v34 }
 0x170   :  { %1442 = vmatprep.subr.mxu0 %v1690_v6 }
 0x171   :  { %1443 = vmatpush3.msra.mxu0 %v1881_v36 }
 0x172   :  { %1444 = vmatprep.subr.mxu0 %v1690_v6 }
 0x173   :  { %1445 = vmatpush3.msra.mxu0 %v1891_v38 }
 0x174   :  { %1446 = vmatprep.subr.mxu0 %v1690_v6 }
 0x175   :  { %1447 = vmatpush3.msra.mxu0 %v1901_v40 }
 0x176   :  { %1486 = vmatprep.subr.mxu0 %v1690_v6 }
 0x216   :  { %v365_v1 = vpop.f32.mrf.mxu0 }
 0x217   :  { %v369_v2 = vadd.f32 %v1301_v55, %v365_v1 }
 0x218   :  { %v1380_v3 = vpop.f32.mrf.mxu0 }
 0x219   :  { %1643 = vtanh.f32 %v369_v2 }
 0x226   :  { %v2037_v4 = vpop.eup %1643 }
 0x227   :  { %1414 = vmatmul.mubr.f32.vlgmr.msra.gmra.mxu1 %v2037_v4 }
 0x228   :  { %1452 = vmatpush3.msra.mxu1 %v1742_v7  ;;  %1483 = vmatprep.mubr.msk.f32.mxu1 %vm1691_vm0, %v1690_v6 }
 0x229   :  { %1453 = vmatprep.subr.mxu1 %v1690_v6 }
 0x22a   :  { %1454 = vmatpush3.msra.mxu1 %v1753_v9 }
 0x22b   :  { %1455 = vmatprep.subr.mxu1 %v1690_v6 }
 0x22c   :  { %1456 = vmatpush3.msra.mxu1 %v1762_v11 }
 0x22d   :  { %1457 = vmatprep.subr.mxu1 %v1690_v6 }
 0x22e   :  { %1458 = vmatpush3.msra.mxu1 %v1779_v15 }
 0x22f   :  { %1459 = vmatprep.subr.mxu1 %v1690_v6 }
 0x230   :  { %1460 = vmatpush3.msra.mxu1 %v1792_v18 }
 0x231   :  { %1461 = vmatprep.subr.mxu1 %v1690_v6 }
 0x232   :  { %1462 = vmatpush3.msra.mxu1 %v1801_v20 }
 0x233   :  { %1463 = vmatprep.subr.mxu1 %v1690_v6 }
 0x234   :  { %1464 = vmatpush3.msra.mxu1 %v1811_v22 }
 0x235   :  { %1465 = vmatprep.subr.mxu1 %v1690_v6 }
 0x236   :  { %1466 = vmatpush3.msra.mxu1 %v1821_v24 }
 0x237   :  { %1467 = vmatprep.subr.mxu1 %v1690_v6 }
 0x238   :  { %1468 = vmatpush3.msra.mxu1 %v1831_v26 }
 0x239   :  { %1469 = vmatprep.subr.mxu1 %v1690_v6 }
 0x23a   :  { %1470 = vmatpush3.msra.mxu1 %v1841_v28 }
 0x23b   :  { %1471 = vmatprep.subr.mxu1 %v1690_v6 }
 0x23c   :  { %1472 = vmatpush3.msra.mxu1 %v1851_v30 }
 0x23d   :  { %1473 = vmatprep.subr.mxu1 %v1690_v6 }
 0x23e   :  { %1474 = vmatpush3.msra.mxu1 %v1861_v32 }
 0x23f   :  { %1475 = vmatprep.subr.mxu1 %v1690_v6 }
 0x240   :  { %1476 = vmatpush3.msra.mxu1 %v1871_v34 }
 0x241   :  { %1477 = vmatprep.subr.mxu1 %v1690_v6 }
 0x242   :  { %1478 = vmatpush3.msra.mxu1 %v1881_v36 }
 0x243   :  { %1479 = vmatprep.subr.mxu1 %v1690_v6 }
 0x244   :  { %1480 = vmatpush3.msra.mxu1 %v1891_v38 }
 0x245   :  { %1481 = vmatprep.subr.mxu1 %v1690_v6 }
 0x246   :  { %1482 = vmatpush3.msra.mxu1 %v1901_v40 }
 0x247   :  { %1521 = vmatprep.subr.mxu1 %v1690_v6 }
 0x2e7   :  { %v441_v5 = vpop.f32.mrf.mxu1 }
 0x2e8   :  { %v445_v8 = vadd.f32 %v441_v5, %v170_v60 }
 0x2e9   :  { %v1415_v10 = vpop.f32.mrf.mxu1 }
 0x2ea   :  { %1645 = vtanh.f32 %v445_v8 }
 0x2f7   :  { %v2074_v12 = vpop.eup %1645 }
 0x2f8   :  { %1449 = vmatmul.mubr.f32.vlgmr.msra.gmra.mxu0 %v2074_v12 }
 0x2f9   :  { %1487 = vmatpush3.msra.mxu0 %v1742_v7  ;;  %1518 = vmatprep.mubr.msk.f32.mxu0 %vm1691_vm0, %v1690_v6 }
 0x2fa   :  { %1488 = vmatprep.subr.mxu0 %v1690_v6 }
 0x2fb   :  { %1489 = vmatpush3.msra.mxu0 %v1753_v9 }
 0x2fc   :  { %1490 = vmatprep.subr.mxu0 %v1690_v6 }
 0x2fd   :  { %1491 = vmatpush3.msra.mxu0 %v1762_v11 }
 0x2fe   :  { %1492 = vmatprep.subr.mxu0 %v1690_v6 }
 0x2ff   :  { %1493 = vmatpush3.msra.mxu0 %v1779_v15 }
 0x300   :  { %1494 = vmatprep.subr.mxu0 %v1690_v6 }
 0x301   :  { %1495 = vmatpush3.msra.mxu0 %v1792_v18 }
 0x302   :  { %1496 = vmatprep.subr.mxu0 %v1690_v6 }
 0x303   :  { %1497 = vmatpush3.msra.mxu0 %v1801_v20 }
 0x304   :  { %1498 = vmatprep.subr.mxu0 %v1690_v6 }
 0x305   :  { %1499 = vmatpush3.msra.mxu0 %v1811_v22 }
 0x306   :  { %1500 = vmatprep.subr.mxu0 %v1690_v6 }
 0x307   :  { %1501 = vmatpush3.msra.mxu0 %v1821_v24 }
 0x308   :  { %1502 = vmatprep.subr.mxu0 %v1690_v6 }
 0x309   :  { %1503 = vmatpush3.msra.mxu0 %v1831_v26 }
 0x30a   :  { %1504 = vmatprep.subr.mxu0 %v1690_v6 }
 0x30b   :  { %1505 = vmatpush3.msra.mxu0 %v1841_v28 }
 0x30c   :  { %1506 = vmatprep.subr.mxu0 %v1690_v6 }
 0x30d   :  { %1507 = vmatpush3.msra.mxu0 %v1851_v30 }
 0x30e   :  { %1508 = vmatprep.subr.mxu0 %v1690_v6 }
 0x30f   :  { %1509 = vmatpush3.msra.mxu0 %v1861_v32 }
 0x310   :  { %1510 = vmatprep.subr.mxu0 %v1690_v6 }
 0x311   :  { %1511 = vmatpush3.msra.mxu0 %v1871_v34 }
 0x312   :  { %1512 = vmatprep.subr.mxu0 %v1690_v6 }
 0x313   :  { %1513 = vmatpush3.msra.mxu0 %v1881_v36 }
 0x314   :  { %1514 = vmatprep.subr.mxu0 %v1690_v6 }
 0x315   :  { %1515 = vmatpush3.msra.mxu0 %v1891_v38 }
 0x316   :  { %1516 = vmatprep.subr.mxu0 %v1690_v6 }
 0x317   :  { %1517 = vmatpush3.msra.mxu0 %v1901_v40 }
 0x318   :  { %1556 = vmatprep.subr.mxu0 %v1690_v6 }
 0x3b8   :  { %v517_v13 = vpop.f32.mrf.mxu0 }
 0x3b9   :  { %v521_v14 = vadd.f32 %v2027_v59, %v517_v13 }
 0x3ba   :  { %v1450_v16 = vpop.f32.mrf.mxu0 }
 0x3bb   :  { %1647 = vtanh.f32 %v521_v14 }
 0x3c8   :  { %v2112_v17 = vpop.eup %1647 }
 0x3c9   :  { %1484 = vmatmul.mubr.f32.vlgmr.msra.gmra.mxu1 %v2112_v17 }
 0x3ca   :  { %1522 = vmatpush3.msra.mxu1 %v1742_v7  ;;  %1553 = vmatprep.mubr.msk.f32.mxu1 %vm1691_vm0, %v1690_v6 }
 0x3cb   :  { %1523 = vmatprep.subr.mxu1 %v1690_v6 }
 0x3cc   :  { %1524 = vmatpush3.msra.mxu1 %v1753_v9 }
 0x3cd   :  { %1525 = vmatprep.subr.mxu1 %v1690_v6 }
 0x3ce   :  { %1526 = vmatpush3.msra.mxu1 %v1762_v11 }
 0x3cf   :  { %1527 = vmatprep.subr.mxu1 %v1690_v6 }
 0x3d0   :  { %1528 = vmatpush3.msra.mxu1 %v1779_v15 }
 0x3d1   :  { %1529 = vmatprep.subr.mxu1 %v1690_v6 }
 0x3d2   :  { %1530 = vmatpush3.msra.mxu1 %v1792_v18 }
 0x3d3   :  { %1531 = vmatprep.subr.mxu1 %v1690_v6 }
 0x3d4   :  { %1532 = vmatpush3.msra.mxu1 %v1801_v20 }
 0x3d5   :  { %1533 = vmatprep.subr.mxu1 %v1690_v6 }
 0x3d6   :  { %1534 = vmatpush3.msra.mxu1 %v1811_v22 }
 0x3d7   :  { %1535 = vmatprep.subr.mxu1 %v1690_v6 }
 0x3d8   :  { %1536 = vmatpush3.msra.mxu1 %v1821_v24 }
 0x3d9   :  { %1537 = vmatprep.subr.mxu1 %v1690_v6 }
 0x3da   :  { %1538 = vmatpush3.msra.mxu1 %v1831_v26 }
 0x3db   :  { %1539 = vmatprep.subr.mxu1 %v1690_v6 }
 0x3dc   :  { %1540 = vmatpush3.msra.mxu1 %v1841_v28 }
 0x3dd   :  { %1541 = vmatprep.subr.mxu1 %v1690_v6 }
 0x3de   :  { %1542 = vmatpush3.msra.mxu1 %v1851_v30 }
 0x3df   :  { %1543 = vmatprep.subr.mxu1 %v1690_v6 }
 0x3e0   :  { %1544 = vmatpush3.msra.mxu1 %v1861_v32 }
 0x3e1   :  { %1545 = vmatprep.subr.mxu1 %v1690_v6 }
 0x3e2   :  { %1546 = vmatpush3.msra.mxu1 %v1871_v34 }
 0x3e3   :  { %1547 = vmatprep.subr.mxu1 %v1690_v6 }
 0x3e4   :  { %1548 = vmatpush3.msra.mxu1 %v1881_v36 }
 0x3e5   :  { %1549 = vmatprep.subr.mxu1 %v1690_v6 }
 0x3e6   :  { %1550 = vmatpush3.msra.mxu1 %v1891_v38 }
 0x3e7   :  { %1551 = vmatprep.subr.mxu1 %v1690_v6 }
 0x3e8   :  { %1552 = vmatpush3.msra.mxu1 %v1901_v40 }
 0x489   :  { %v593_v19 = vpop.f32.mrf.mxu1 }
 0x48a   :  { %v597_v21 = vadd.f32 %v593_v19, %v2031_v62 }
 0x48b   :  { %v1485_v23 = vpop.f32.mrf.mxu1 }
 0x48c   :  { %1649 = vtanh.f32 %v597_v21 }
 0x499   :  { %v2149_v25 = vpop.eup %1649 }
 0x49a   :  { %1519 = vmatmul.mubr.f32.vlgmr.msra.gmra.mxu0 %v2149_v25 }
 0x49b   :  { %1557 = vmatpush3.msra.mxu0 %v1742_v7  ;;  %1588 = vmatprep.mubr.msk.f32.mxu0 %vm1691_vm0, %v1690_v6  ;;  %v852_v7 = vld [vmem:[%s2312_s3 + $0x78] sm:$0xff] }
 0x49c   :  { %1558 = vmatprep.subr.mxu0 %v1690_v6  ;;  %1591 = vmatprep.subr.mxu1 %v852_v7 }
 0x49d   :  { %1559 = vmatpush3.msra.mxu0 %v1753_v9 }
 0x49e   :  { %1560 = vmatprep.subr.mxu0 %v1690_v6 }
 0x49f   :  { %1561 = vmatpush3.msra.mxu0 %v1762_v11 }
 0x4a0   :  { %1562 = vmatprep.subr.mxu0 %v1690_v6 }
 0x4a1   :  { %1563 = vmatpush3.msra.mxu0 %v1779_v15 }
 0x4a2   :  { %1564 = vmatprep.subr.mxu0 %v1690_v6 }
 0x4a3   :  { %1565 = vmatpush3.msra.mxu0 %v1792_v18 }
 0x4a4   :  { %1566 = vmatprep.subr.mxu0 %v1690_v6 }
 0x4a5   :  { %1567 = vmatpush3.msra.mxu0 %v1801_v20  ;;  %v851_v20 = vld [vmem:[%s2312_s3 + $0x70] sm:$0xff] }
 0x4a6   :  { %1568 = vmatprep.subr.mxu0 %v1690_v6 }
 0x4a7   :  { %1569 = vmatpush3.msra.mxu0 %v1811_v22  ;;  %v849_v22 = vld [vmem:[%s2312_s3 + $0x60] sm:$0xff] }
 0x4a8   :  { %1570 = vmatprep.subr.mxu0 %v1690_v6 }
 0x4a9   :  { %1571 = vmatpush3.msra.mxu0 %v1821_v24  ;;  %v848_v24 = vld [vmem:[%s2312_s3 + $0x58] sm:$0xff] }
 0x4aa   :  { %1572 = vmatprep.subr.mxu0 %v1690_v6 }
 0x4ab   :  { %1573 = vmatpush3.msra.mxu0 %v1831_v26  ;;  %v847_v26 = vld [vmem:[%s2312_s3 + $0x50] sm:$0xff] }
 0x4ac   :  { %1574 = vmatprep.subr.mxu0 %v1690_v6 }
 0x4ad   :  { %1575 = vmatpush3.msra.mxu0 %v1841_v28  ;;  %v845_v28 = vld [vmem:[%s2312_s3 + $0x40] sm:$0xff] }
 0x4ae   :  { %1576 = vmatprep.subr.mxu0 %v1690_v6 }
 0x4af   :  { %1577 = vmatpush3.msra.mxu0 %v1851_v30  ;;  %v843_v30 = vld [vmem:[%s2312_s3 + $0x30] sm:$0xff] }
 0x4b0   :  { %1578 = vmatprep.subr.mxu0 %v1690_v6 }
 0x4b1   :  { %1579 = vmatpush3.msra.mxu0 %v1861_v32  ;;  %v841_v32 = vld [vmem:[%s2312_s3 + $0x20] sm:$0xff] }
 0x4b2   :  { %1580 = vmatprep.subr.mxu0 %v1690_v6 }
 0x4b3   :  { %1581 = vmatpush3.msra.mxu0 %v1871_v34  ;;  %v839_v34 = vld [vmem:[%s2312_s3 + $0x10] sm:$0xff] }
 0x4b4   :  { %1582 = vmatprep.subr.mxu0 %v1690_v6 }
 0x4b5   :  { %1583 = vmatpush3.msra.mxu0 %v1881_v36  ;;  %v837_v36 = vld [vmem:[%s2312_s3] sm:$0xff] }
 0x4b6   :  { %1584 = vmatprep.subr.mxu0 %v1690_v6 }
 0x4b7   :  { %1585 = vmatpush3.msra.mxu0 %v1891_v38 }
 0x4b8   :  { %1586 = vmatprep.subr.mxu0 %v1690_v6  ;;  %v850_v6 = vld [vmem:[%s2312_s3 + $0x68] sm:$0xff] }
 0x4b9   :  { %1587 = vmatpush3.msra.mxu0 %v1901_v40 }
 0x55a   :  { %v669_v9 = vpop.f32.mrf.mxu0 }
 0x55b   :  { %v673_v11 = vadd.f32 %v2029_v61, %v669_v9 }
 0x55c   :  { %v1520_v15 = vpop.f32.mrf.mxu0 }
 0x55d   :  { %1651 = vtanh.f32 %v673_v11 }
 0x56a   :  { %v1652_v18 = vpop.eup %1651 }
 0x56b   :  { %1554 = vmatmul.mubr.f32.vlgmr.msra.gmra.mxu1 %v1652_v18 }
 0x56c   :  { %1592 = vmatpush3.msra.mxu1 %v852_v7  ;;  %1623 = vmatprep.mubr.f32.mxu1 %v1990_v58 }
 0x56d   :  { %1593 = vmatprep.subr.mxu1 %v851_v20 }
 0x56e   :  { %1594 = vmatpush3.msra.mxu1 %v851_v20 }
 0x56f   :  { %1595 = vmatprep.subr.mxu1 %v850_v6 }
 0x570   :  { %1596 = vmatpush3.msra.mxu1 %v850_v6 }
 0x571   :  { %1597 = vmatprep.subr.mxu1 %v849_v22 }
 0x572   :  { %1598 = vmatpush3.msra.mxu1 %v849_v22 }
 0x573   :  { %1599 = vmatprep.subr.mxu1 %v848_v24 }
 0x574   :  { %1600 = vmatpush3.msra.mxu1 %v848_v24 }
 0x575   :  { %1601 = vmatprep.subr.mxu1 %v847_v26 }
 0x576   :  { %1602 = vmatpush3.msra.mxu1 %v847_v26 }
 0x577   :  { %1603 = vmatprep.subr.mxu1 %v846_v27 }
 0x578   :  { %1604 = vmatpush3.msra.mxu1 %v846_v27 }
 0x579   :  { %1605 = vmatprep.subr.mxu1 %v845_v28 }
 0x57a   :  { %1606 = vmatpush3.msra.mxu1 %v845_v28 }
 0x57b   :  { %1607 = vmatprep.subr.mxu1 %v844_v29 }
 0x57c   :  { %1608 = vmatpush3.msra.mxu1 %v844_v29 }
 0x57d   :  { %1609 = vmatprep.subr.mxu1 %v843_v30 }
 0x57e   :  { %1610 = vmatpush3.msra.mxu1 %v843_v30 }
 0x57f   :  { %1611 = vmatprep.subr.mxu1 %v842_v31 }
 0x580   :  { %1612 = vmatpush3.msra.mxu1 %v842_v31 }
 0x581   :  { %1613 = vmatprep.subr.mxu1 %v841_v32 }
 0x582   :  { %1614 = vmatpush3.msra.mxu1 %v841_v32 }
 0x583   :  { %1615 = vmatprep.subr.mxu1 %v840_v33 }
 0x584   :  { %1616 = vmatpush3.msra.mxu1 %v840_v33 }
 0x585   :  { %1617 = vmatprep.subr.mxu1 %v839_v34 }
 0x586   :  { %1618 = vmatpush3.msra.mxu1 %v839_v34 }
 0x587   :  { %1619 = vmatprep.subr.mxu1 %v838_v35 }
 0x588   :  { %1620 = vmatpush3.msra.mxu1 %v838_v35 }
 0x589   :  { %1621 = vmatprep.subr.mxu1 %v837_v36 }
 0x58a   :  { %1622 = vmatpush3.msra.mxu1 %v837_v36 }
 0x58b   :  { %1624 = vmatmul.mubr.f32.vlgmr.msra.gmra.mxu1 %v2037_v4 }
 0x58c   :  { %1626 = vmatprep.mubr.f32.mxu1 %v2074_v12 }
 0x58f   :  { %1627 = vmatmul.mubr.f32.gmra.mxu1 %v2112_v17 }
 0x590   :  { %1629 = vmatprep.mubr.f32.mxu1 %v2149_v25 }
 0x593   :  { %1630 = vmatmul.mubr.f32.gmra.mxu1 %v1652_v18 }
 0x62b   :  { %v745_v37 = vpop.f32.mrf.mxu1 }
 0x62c   :  { %v749_v38 = vadd.f32 %v745_v37, %v2035_v0 }
 0x62d   :  { %v1555_v39 = vpop.f32.mrf.mxu1 }
 0x62e   :  { %1653 = vtanh.f32 %v749_v38 }
 0x63b   :  { %v1654_v40 = vpop.eup %1653 }
 0x63c   :  { %1589 = vmatmul.mubr.f32.vlgmr.msra.gmra.mxu0 %v1654_v40  ;;  %1632 = vmatprep.mubr.f32.mxu1 %v1654_v40 }
 0x64b   :  { %v1625_v42 = vpop.f32.mrf.mxu1 }
 0x64c   :  { %v932_v44 = vadd.f32 %v1625_v42, %v1082_v41 }
 0x64d   :  { %v926_v45 = vpop.f32.mrf.mxu1 }
 0x64e   :  { %v927_v46 = vadd.f32 %v1082_v41, %v926_v45  ;;  %v967_v47 = vsel %vm965_vm9, %v932_v44, -1e+30 }
 0x64f   :  { %976 = vmax.xlane.f32.xlu1 %v967_v47  ;;  %v1628_v48 = vpop.f32.mrf.mxu1 }
 0x650   :  { %v942_v49 = vadd.f32 %v1628_v48, %v1082_v41  ;;  %v966_v50 = vsel %vm965_vm9, %v927_v46, -1e+30 }
 0x651   :  { %v936_v51 = vpop.f32.mrf.mxu1  ;;  %974 = vmax.xlane.f32.xlu0 %v966_v50 }
 0x652   :  { %v937_v53 = vadd.f32 %v1082_v41, %v936_v51  ;;  %v969_v54 = vsel %vm965_vm9, %v942_v49, -1e+30 }
 0x653   :  { %v1631_v52 = vpop.f32.mrf.mxu1 }
 0x654   :  { %v952_v57 = vadd.f32 %v1631_v52, %v1082_v41  ;;  %v968_v59 = vsel %vm965_vm9, %v937_v53, -1e+30 }
 0x655   :  { %v946_v55 = vpop.f32.mrf.mxu1  ;;  %980 = vmax.xlane.f32.xlu0 %v969_v54 }
 0x656   :  { %v947_v56 = vadd.f32 %v1082_v41, %v946_v55  ;;  %v971_v60 = vsel %vm965_vm9, %v952_v57, -1e+30 }
 0x658   :  { %v970_v58 = vsel %vm965_vm9, %v947_v56, -1e+30 }
 0x659   :  { %982 = vmax.xlane.f32.xlu1 %v970_v58  ;;  %978 = vmax.xlane.f32.xlu0 %v968_v59 }
 0x65d   :  { %984 = vmax.xlane.f32.xlu0 %v971_v60 }
 0x6d8   :  { %v977_v4 = vpop.xlane.xlu1 %976 }
 0x6d9   :  { %v2257_v8 = vsub.f32 %v967_v47, %v977_v4 }
 0x6da   :  { %v975_v2 = vpop.xlane.xlu0 %974 }
 0x6db   :  { %v2259_v10 = vsub.f32 %v966_v50, %v975_v2  ;;  %v1000_v12 = vmul.f32 1.442695, %v2257_v8 }
 0x6dd   :  { %v998_v16 = vmul.f32 1.442695, %v2259_v10 }
 0x6de   :  { %v981_v3 = vpop.xlane.xlu0 %980 }
 0x6df   :  { %v2262_v13 = vsub.f32 %v969_v54, %v981_v3 }
 0x6e1   :  { %v1004_v19 = vmul.f32 1.442695, %v2262_v13 }
 0x6e2   :  { %v979_v5 = vpop.xlane.xlu0 %978  ;;  %v983_v17 = vpop.xlane.xlu1 %982 }
 0x6e3   :  { %v2270_v23 = vsub.f32 %v970_v58, %v983_v17 }
 0x6e5   :  { %v1006_v9 = vmul.f32 1.442695, %v2270_v23 }
 0x6e6   :  { %v985_v14 = vpop.xlane.xlu0 %984 }
 0x6e7   :  { %v2268_v21 = vsub.f32 %v971_v60, %v985_v14 }
 0x6e9   :  { %v1008_v7 = vmul.f32 1.442695, %v2268_v21 }
 0x6fc   :  { %v821_v61 = vpop.f32.mrf.mxu0 }
 0x6fd   :  { %v825_v62 = vadd.f32 %v2033_v63, %v821_v61  ;;  %v2265_v63 = vsub.f32 %v968_v59, %v979_v5 }
 0x6fe   :  { %v1590_v0 = vpop.f32.mrf.mxu0 }
 0x6ff   :  { %1655 = vtanh.f32 %v825_v62  ;;  %v1002_v25 = vmul.f32 1.442695, %v2265_v63 }
 0x700   :  { %1657 = vpow2.f32 %v1000_v12 }
 0x701   :  { %1659 = vpow2.f32 %v998_v16 }
 0x702   :  { %1661 = vpow2.f32 %v1004_v19 }
 0x703   :  { %1663 = vpow2.f32 %v1002_v25 }
 0x704   :  { %1665 = vpow2.f32 %v1008_v7 }
 0x705   :  { %1667 = vpow2.f32 %v1006_v9 }
 0x70c   :  { %v1656_v1 = vpop.eup %1655 }
 0x70d   :  { %1633 = vmatmul.mubr.f32.gmra.mxu1 %v1656_v1  ;;  %v1658_v24 = vpop.eup %1657 }
 0x70e   :  { %v1660_v26 = vpop.eup %1659 }
 0x70f   :  { %v1662_v27 = vpop.eup %1661 }
 0x710   :  { %v1664_v28 = vpop.eup %1663 }
 0x711   :  { %v1666_v29 = vpop.eup %1665 }
 0x712   :  { %v1668_v30 = vpop.eup %1667 }
 0x7cd   :  { %v1634_v11 = vpop.f32.mrf.mxu1 }
 0x7ce   :  { %v962_v15 = vadd.f32 %v1634_v11, %v1082_v41 }
 0x7cf   :  { %v956_v18 = vpop.f32.mrf.mxu1 }
 0x7d0   :  { %v957_v20 = vadd.f32 %v1082_v41, %v956_v18  ;;  %v973_v6 = vsel %vm965_vm9, %v962_v15, -1e+30 }
 0x7d1   :  { %988 = vmax.xlane.f32.xlu0 %v973_v6 }
 0x7d2   :  { %v972_v22 = vsel %vm965_vm9, %v957_v20, -1e+30 }
 0x7d3   :  { %986 = vmax.xlane.f32.xlu1 %v972_v22 }
 0x7d5   :  { %1016 = vadd.xlane.f32.xlu0 %v1658_v24 }
 0x7d7   :  { %1014 = vadd.xlane.f32.xlu1 %v1660_v26 }
 0x7d9   :  { %1020 = vadd.xlane.f32.xlu0 %v1662_v27 }
 0x7db   :  { %1018 = vadd.xlane.f32.xlu1 %v1664_v28 }
 0x7dd   :  { %1024 = vadd.xlane.f32.xlu0 %v1666_v29 }
 0x7df   :  { %1022 = vadd.xlane.f32.xlu1 %v1668_v30 }
 0x85a   :  { %v989_v31 = vpop.xlane.xlu0 %988 }
 0x85b   :  { %v997_v32 = vsub.f32 %v973_v6, %v989_v31 }
 0x85c   :  { %v987_v33 = vpop.xlane.xlu1 %986 }
 0x85d   :  { %v1012_v34 = vmul.f32 1.442695, %v997_v32  ;;  %v996_v35 = vsub.f32 %v972_v22, %v987_v33 }
 0x85e   :  { %v1017_v43 = vpop.xlane.xlu0 %1016 }
 0x85f   :  { %1669 = vpow2.f32 %v1012_v34  ;;  %v1010_v36 = vmul.f32 1.442695, %v996_v35 }
 0x860   :  { %1671 = vlog2.f32 %v1017_v43  ;;  %v1015_v37 = vpop.xlane.xlu1 %1014 }
 0x861   :  { %1673 = vpow2.f32 %v1010_v36 }
 0x862   :  { %1675 = vlog2.f32 %v1015_v37  ;;  %v1021_v38 = vpop.xlane.xlu0 %1020 }
 0x863   :  { %1677 = vlog2.f32 %v1021_v38 }
 0x864   :  { %v1019_v39 = vpop.xlane.xlu1 %1018 }
 0x865   :  { %1679 = vlog2.f32 %v1019_v39 }
 0x866   :  { %v1025_v40 = vpop.xlane.xlu0 %1024 }
 0x867   :  { %1681 = vlog2.f32 %v1025_v40 }
 0x868   :  { %v1023_v41 = vpop.xlane.xlu1 %1022 }
 0x869   :  { %1683 = vlog2.f32 %v1023_v41 }
 0x86c   :  { %v1670_v42 = vpop.eup %1669 }
 0x86d   :  { %v1672_v44 = vpop.eup %1671  ;;  %1028 = vadd.xlane.f32.xlu0 %v1670_v42 }
 0x86e   :  { %v1674_v45 = vpop.eup %1673  ;;  %v1033_v46 = vmul.f32 0.6931472, %v1672_v44 }
 0x86f   :  { %v1676_v47 = vpop.eup %1675  ;;  %1026 = vadd.xlane.f32.xlu1 %v1674_v45 }
 0x870   :  { %v1678_v48 = vpop.eup %1677  ;;  %v1047_v49 = vsub.f32 %v2257_v8, %v1033_v46  ;;  %v1031_v50 = vmul.f32 0.6931472, %v1676_v47 }
 0x871   :  { %v1037_v51 = vmul.f32 0.6931472, %v1678_v48 }
 0x872   :  { %v1680_v52 = vpop.eup %1679  ;;  %1055 = vst [vmem:[%s2314_s5 + $0x8] sm:$0xff] %v1047_v49  ;;  %v1046_v53 = vsub.f32 %v2259_v10, %v1031_v50 }
 0x873   :  { %v1049_v54 = vsub.f32 %v2262_v13, %v1037_v51  ;;  %v1035_v55 = vmul.f32 0.6931472, %v1680_v52 }
 0x874   :  { %v1682_v56 = vpop.eup %1681  ;;  %1054 = vst [vmem:[%s2314_s5] sm:$0xff] %v1046_v53 }
 0x875   :  { %1057 = vst [vmem:[%s2314_s5 + $0x18] sm:$0xff] %v1049_v54  ;;  %v1048_v57 = vsub.f32 %v2265_v63, %v1035_v55  ;;  %v1041_v58 = vmul.f32 0.6931472, %v1682_v56 }
 0x876   :  { %v1684_v59 = vpop.eup %1683 }
 0x877   :  { %1056 = vst [vmem:[%s2314_s5 + $0x10] sm:$0xff] %v1048_v57  ;;  %v1051_v60 = vsub.f32 %v2268_v21, %v1041_v58  ;;  %v1039_v61 = vmul.f32 0.6931472, %v1684_v59 }
 0x879   :  { %1059 = vst [vmem:[%s2314_s5 + $0x28] sm:$0xff] %v1051_v60  ;;  %v1050_v62 = vsub.f32 %v2270_v23, %v1039_v61 }
 0x87b   :  { %1058 = vst [vmem:[%s2314_s5 + $0x20] sm:$0xff] %v1050_v62 }
 0x8f6   :  { %v1029_v0 = vpop.xlane.xlu0 %1028 }
 0x8f7   :  { %1685 = vlog2.f32 %v1029_v0 }
 0x8f8   :  { %v1027_v1 = vpop.xlane.xlu1 %1026 }
 0x8f9   :  { %1687 = vlog2.f32 %v1027_v1 }
 0x904   :  { %v1686_v2 = vpop.eup %1685 }
 0x905   :  { %v1045_v3 = vmul.f32 0.6931472, %v1686_v2 }
 0x906   :  { %v1688_v4 = vpop.eup %1687 }
 0x907   :  { %v1053_v5 = vsub.f32 %v997_v32, %v1045_v3  ;;  %v1043_v8 = vmul.f32 0.6931472, %v1688_v4 }
 0x909   :  { %1061 = vst [vmem:[%s2314_s5 + $0x38] sm:$0xff] %v1053_v5  ;;  %v1052_v10 = vsub.f32 %v996_v35, %v1043_v8 }
 0x90b   :  { %1060 = vst [vmem:[%s2314_s5 + $0x30] sm:$0xff] %v1052_v10 }

</bundles_post_ra>
